<compile_context>
chip_gen: v6e
topology: v6e:2x2x1
jax: 0.10.0
libtpu: 0.0.40
codegen_flags: <defaults>
</compile_context>

<pallas_src>
import functools

import jax
import jax.numpy as jnp
from jax.experimental import pallas as pl
from jax.experimental.pallas import tpu as pltpu

_LANE = 128


def _pa_kernel(w1_ref, b1_ref, w2_ref, b2_ref, x_ref, o_ref):
    """One (batch, row-block) grid step.

    w1_ref: (Cmid, C) f32 SMEM   first 1x1 conv weight
    b1_ref: (Cmid,)   f32 SMEM
    w2_ref: (Cmid,)   f32 SMEM   second 1x1 conv weight (out channels = 1)
    b2_ref: (1,)      f32 SMEM
    x_ref / o_ref: (1, C, BR, 128) VMEM blocks (pixels on sublanes/lanes)
    """
    c = x_ref.shape[1]
    cmid = b1_ref.shape[0]

    # ---- 1x1 conv (C -> Cmid) as unrolled VPU FMAs --------------------------
    # Channel-outer loop: each channel slab is read once from the resident
    # VMEM block and cast to f32 once -- no whole-block f32 copy materialized.
    hidden = [None] * cmid
    for i in range(c):
        xi = x_ref[0, i].astype(jnp.float32)           # (BR, 128)
        for j in range(cmid):
            t = w1_ref[j, i] * xi
            hidden[j] = t if hidden[j] is None else hidden[j] + t

    # ---- bias + ReLU, 1x1 conv (Cmid -> 1), bias, sigmoid --------------------
    s = None
    for j in range(cmid):
        hj = jnp.maximum(hidden[j] + b1_ref[j], 0.0)
        t = w2_ref[j] * hj
        s = t if s is None else s + t
    s = s + b2_ref[0]
    # exp and reciprocal both run on the EUP slot; no select-based stable-
    # sigmoid chain on the VALU.  (approx=True is a v7x micro-opt if needed.)
    y = pl.reciprocal(1.0 + jnp.exp(-s), approx=False)  # (BR, 128)

    # ---- pixel attention: gate each channel slab in the input dtype ---------
    y_x = y.astype(x_ref.dtype)
    for i in range(c):
        o_ref[0, i] = (x_ref[0, i] * y_x).astype(o_ref.dtype)


@functools.partial(jax.jit, static_argnames=("block_rows",))
def pa_layer(x_nchw, w1, b1, w2, b2, *, block_rows=512):
    """x_nchw: (N, C, H, W).  Weights follow PyTorch Conv2d 1x1 shapes:
       w1: (Cmid, C, 1, 1), b1: (Cmid,), w2: (1, Cmid, 1, 1), b2: (1,)."""
    n, c, h, w = x_nchw.shape
    cmid = w1.shape[0]
    assert cmid >= 1, "PALayer needs channel >= 3 so that channel // 3 >= 1"
    p = h * w
    itemsize = jnp.dtype(x_nchw.dtype).itemsize

    # Pixel axis factored as (rows, 128).  Only the lane pad (multiple of 128)
    # is materialized; partial row-blocks are handled by Pallas masking.
    rows = -(-p // _LANE)
    p_pad = rows * _LANE

    if rows <= 8:
        # Full-extent exception to the (8,128) rule: no rows padding for tiny
        # images (e.g. 16x16 -> rows=2).
        br = rows
    else:
        br = max(8, (int(block_rows) // 8) * 8)
        br = min(br, (rows // 8) * 8)                 # never exceed the array
        # Keep the double-buffered (in + out) pipeline <= ~24 MiB so it fits
        # comfortably inside v7x's 64 MiB VMEM (and the 32 MiB scoped limit).
        bytes_per_row = c * _LANE * itemsize
        max_br = max(8, ((24 << 20) // (4 * bytes_per_row)) // 8 * 8)
        br = min(br, max_br)
        # Keep >= ~8 grid steps so both v7x TensorCores stay fed.
        steps = n * (-(-rows // br))
        if steps < 8:
            want_blocks = -(-8 // n)
            br = min(br, max(8, ((-(-rows // want_blocks)) // 8) * 8))

    grid_r = -(-rows // br)

    x_flat = x_nchw.reshape(n, c, p)
    if p_pad != p:
        x_flat = jnp.pad(x_flat, ((0, 0), (0, 0), (0, p_pad - p)))
    x4 = x_flat.reshape(n, c, rows, _LANE)

    # Conv2d 1x1 params -> flat f32 scalars, held whole in SMEM (a handful of
    # floats; no per-step VMEM weight DMAs).
    w1m = w1.reshape(cmid, c).astype(jnp.float32)      # (Cmid, C)
    b1m = b1.reshape(cmid).astype(jnp.float32)         # (Cmid,)
    w2m = w2.reshape(cmid).astype(jnp.float32)         # (Cmid,)
    b2m = b2.reshape(1).astype(jnp.float32)            # (1,)

    smem_spec = pl.BlockSpec(memory_space=pltpu.MemorySpace.SMEM)
    data_spec = pl.BlockSpec((1, c, br, _LANE), lambda b, r: (b, 0, r, 0))

    out4 = pl.pallas_call(
        _pa_kernel,
        out_shape=jax.ShapeDtypeStruct((n, c, rows, _LANE), x_nchw.dtype),
        grid_spec=pltpu.PrefetchScalarGridSpec(
            num_scalar_prefetch=0,
            grid=(n, grid_r),
            in_specs=[smem_spec, smem_spec, smem_spec, smem_spec, data_spec],
            out_specs=data_spec,
        ),
        compiler_params=pltpu.CompilerParams(
            dimension_semantics=("parallel", "parallel"),
            vmem_limit_bytes=32 << 20),
    )(w1m, b1m, w2m, b2m, x4)

    out = out4.reshape(n, c, p_pad)
    if p_pad != p:
        out = out[:, :, :p]
    return out.reshape(n, c, h, w)


def _reference(x_nchw, w1, b1, w2, b2):
    """Pure-JAX reference of the PyTorch forward (correctness check)."""
    n, c, h, w = x_nchw.shape
    cmid = w1.shape[0]
    xf = x_nchw.astype(jnp.float32)
    w1m = w1.reshape(cmid, c).astype(jnp.float32)
    w2m = w2.reshape(1, cmid).astype(jnp.float32)
    hmid = jnp.einsum("oc,nchw->nohw", w1m, xf) + b1.reshape(1, cmid, 1, 1)
    hmid = jnp.maximum(hmid, 0.0)
    y = jnp.einsum("oc,nchw->nohw", w2m, hmid) + b2.reshape(1, 1, 1, 1)
    y = jax.nn.sigmoid(y)
    return (xf * y).astype(x_nchw.dtype)


if __name__ == "__main__":
    # Small shapes consistent with PALayer(channel=6): C must be >= 3.
    N, C, H, W = 2, 6, 16, 16
    CMID = C // 3

    key = jax.random.PRNGKey(0)
    kx, k1, kb1, k2, kb2 = jax.random.split(key, 5)

    x = jax.random.normal(kx, (N, C, H, W), dtype=jnp.float32)
    # Deterministic synthetic parameters (PyTorch Conv2d 1x1 shapes).
    w1 = jax.random.normal(k1, (CMID, C, 1, 1), dtype=jnp.float32) * 0.3
    b1 = jax.random.normal(kb1, (CMID,), dtype=jnp.float32) * 0.1
    w2 = jax.random.normal(k2, (1, CMID, 1, 1), dtype=jnp.float32) * 0.3
    b2 = jax.random.normal(kb2, (1,), dtype=jnp.float32) * 0.1

    out = pa_layer(x, w1, b1, w2, b2)
    out = jax.block_until_ready(out)

    ref = _reference(x, w1, b1, w2, b2)
    assert out.shape == x.shape and out.dtype == x.dtype
    assert jnp.allclose(out, ref, atol=1e-5, rtol=1e-5), "mismatch vs reference"

    print("KERNEL_OK")
</pallas_src>

<mosaic_0001>
module attributes {stable_mosaic.version = 11 : i64} {
  func.func @_pa_kernel(%arg0: i32, %arg1: i32, %arg2: memref<2x6xf32, #tpu.memory_space<smem>>, %arg3: memref<2xf32, #tpu.memory_space<smem>>, %arg4: memref<2xf32, #tpu.memory_space<smem>>, %arg5: memref<1xf32, #tpu.memory_space<smem>>, %arg6: memref<1x6x2x128xf32, #tpu.memory_space<vmem>>, %arg7: memref<1x6x2x128xf32, #tpu.memory_space<vmem>>) attributes {dimension_semantics = [#tpu.dimension_semantics<parallel>, #tpu.dimension_semantics<parallel>], iteration_bounds = array<i64: 2, 1>, scalar_prefetch = 0 : i64, scratch_operands = 0 : i64, tpu.core_type = #tpu.core_type<tc>, window_params = [{transform_indices = @transform_0, window_bounds = array<i64: 2, 6>}, {transform_indices = @transform_1, window_bounds = array<i64: 2>}, {transform_indices = @transform_2, window_bounds = array<i64: 2>}, {transform_indices = @transform_3, window_bounds = array<i64: 1>}, {transform_indices = @transform_4, window_bounds = array<i64: 1, 6, 2, 128>}, {transform_indices = @transform_5, window_bounds = array<i64: 1, 6, 2, 128>}]} {
    %c0 = arith.constant 0 : index
    %c0_0 = arith.constant 0 : index
    %c0_1 = arith.constant 0 : index
    %c0_2 = arith.constant 0 : index
    %0 = vector.load %arg6[%c0, %c0_0, %c0_1, %c0_2] : memref<1x6x2x128xf32, #tpu.memory_space<vmem>>, vector<1x1x2x128xf32>
    %1 = vector.shape_cast %0 : vector<1x1x2x128xf32> to vector<2x128xf32>
    %c0_3 = arith.constant 0 : index
    %c0_4 = arith.constant 0 : index
    %2 = memref.load %arg2[%c0_3, %c0_4] : memref<2x6xf32, #tpu.memory_space<smem>>
    %3 = vector.broadcast %2 : f32 to vector<2x128xf32>
    %4 = arith.mulf %3, %1 : vector<2x128xf32>
    %c1 = arith.constant 1 : index
    %c0_5 = arith.constant 0 : index
    %5 = memref.load %arg2[%c1, %c0_5] : memref<2x6xf32, #tpu.memory_space<smem>>
    %6 = vector.broadcast %5 : f32 to vector<2x128xf32>
    %7 = arith.mulf %6, %1 : vector<2x128xf32>
    %c0_6 = arith.constant 0 : index
    %c1_7 = arith.constant 1 : index
    %c0_8 = arith.constant 0 : index
    %c0_9 = arith.constant 0 : index
    %8 = vector.load %arg6[%c0_6, %c1_7, %c0_8, %c0_9] : memref<1x6x2x128xf32, #tpu.memory_space<vmem>>, vector<1x1x2x128xf32>
    %9 = vector.shape_cast %8 : vector<1x1x2x128xf32> to vector<2x128xf32>
    %c0_10 = arith.constant 0 : index
    %c1_11 = arith.constant 1 : index
    %10 = memref.load %arg2[%c0_10, %c1_11] : memref<2x6xf32, #tpu.memory_space<smem>>
    %11 = vector.broadcast %10 : f32 to vector<2x128xf32>
    %12 = arith.mulf %11, %9 : vector<2x128xf32>
    %13 = arith.addf %4, %12 : vector<2x128xf32>
    %c1_12 = arith.constant 1 : index
    %c1_13 = arith.constant 1 : index
    %14 = memref.load %arg2[%c1_12, %c1_13] : memref<2x6xf32, #tpu.memory_space<smem>>
    %15 = vector.broadcast %14 : f32 to vector<2x128xf32>
    %16 = arith.mulf %15, %9 : vector<2x128xf32>
    %17 = arith.addf %7, %16 : vector<2x128xf32>
    %c0_14 = arith.constant 0 : index
    %c2 = arith.constant 2 : index
    %c0_15 = arith.constant 0 : index
    %c0_16 = arith.constant 0 : index
    %18 = vector.load %arg6[%c0_14, %c2, %c0_15, %c0_16] : memref<1x6x2x128xf32, #tpu.memory_space<vmem>>, vector<1x1x2x128xf32>
    %19 = vector.shape_cast %18 : vector<1x1x2x128xf32> to vector<2x128xf32>
    %c0_17 = arith.constant 0 : index
    %c2_18 = arith.constant 2 : index
    %20 = memref.load %arg2[%c0_17, %c2_18] : memref<2x6xf32, #tpu.memory_space<smem>>
    %21 = vector.broadcast %20 : f32 to vector<2x128xf32>
    %22 = arith.mulf %21, %19 : vector<2x128xf32>
    %23 = arith.addf %13, %22 : vector<2x128xf32>
    %c1_19 = arith.constant 1 : index
    %c2_20 = arith.constant 2 : index
    %24 = memref.load %arg2[%c1_19, %c2_20] : memref<2x6xf32, #tpu.memory_space<smem>>
    %25 = vector.broadcast %24 : f32 to vector<2x128xf32>
    %26 = arith.mulf %25, %19 : vector<2x128xf32>
    %27 = arith.addf %17, %26 : vector<2x128xf32>
    %c0_21 = arith.constant 0 : index
    %c3 = arith.constant 3 : index
    %c0_22 = arith.constant 0 : index
    %c0_23 = arith.constant 0 : index
    %28 = vector.load %arg6[%c0_21, %c3, %c0_22, %c0_23] : memref<1x6x2x128xf32, #tpu.memory_space<vmem>>, vector<1x1x2x128xf32>
    %29 = vector.shape_cast %28 : vector<1x1x2x128xf32> to vector<2x128xf32>
    %c0_24 = arith.constant 0 : index
    %c3_25 = arith.constant 3 : index
    %30 = memref.load %arg2[%c0_24, %c3_25] : memref<2x6xf32, #tpu.memory_space<smem>>
    %31 = vector.broadcast %30 : f32 to vector<2x128xf32>
    %32 = arith.mulf %31, %29 : vector<2x128xf32>
    %33 = arith.addf %23, %32 : vector<2x128xf32>
    %c1_26 = arith.constant 1 : index
    %c3_27 = arith.constant 3 : index
    %34 = memref.load %arg2[%c1_26, %c3_27] : memref<2x6xf32, #tpu.memory_space<smem>>
    %35 = vector.broadcast %34 : f32 to vector<2x128xf32>
    %36 = arith.mulf %35, %29 : vector<2x128xf32>
    %37 = arith.addf %27, %36 : vector<2x128xf32>
    %c0_28 = arith.constant 0 : index
    %c4 = arith.constant 4 : index
    %c0_29 = arith.constant 0 : index
    %c0_30 = arith.constant 0 : index
    %38 = vector.load %arg6[%c0_28, %c4, %c0_29, %c0_30] : memref<1x6x2x128xf32, #tpu.memory_space<vmem>>, vector<1x1x2x128xf32>
    %39 = vector.shape_cast %38 : vector<1x1x2x128xf32> to vector<2x128xf32>
    %c0_31 = arith.constant 0 : index
    %c4_32 = arith.constant 4 : index
    %40 = memref.load %arg2[%c0_31, %c4_32] : memref<2x6xf32, #tpu.memory_space<smem>>
    %41 = vector.broadcast %40 : f32 to vector<2x128xf32>
    %42 = arith.mulf %41, %39 : vector<2x128xf32>
    %43 = arith.addf %33, %42 : vector<2x128xf32>
    %c1_33 = arith.constant 1 : index
    %c4_34 = arith.constant 4 : index
    %44 = memref.load %arg2[%c1_33, %c4_34] : memref<2x6xf32, #tpu.memory_space<smem>>
    %45 = vector.broadcast %44 : f32 to vector<2x128xf32>
    %46 = arith.mulf %45, %39 : vector<2x128xf32>
    %47 = arith.addf %37, %46 : vector<2x128xf32>
    %c0_35 = arith.constant 0 : index
    %c5 = arith.constant 5 : index
    %c0_36 = arith.constant 0 : index
    %c0_37 = arith.constant 0 : index
    %48 = vector.load %arg6[%c0_35, %c5, %c0_36, %c0_37] : memref<1x6x2x128xf32, #tpu.memory_space<vmem>>, vector<1x1x2x128xf32>
    %49 = vector.shape_cast %48 : vector<1x1x2x128xf32> to vector<2x128xf32>
    %c0_38 = arith.constant 0 : index
    %c5_39 = arith.constant 5 : index
    %50 = memref.load %arg2[%c0_38, %c5_39] : memref<2x6xf32, #tpu.memory_space<smem>>
    %51 = vector.broadcast %50 : f32 to vector<2x128xf32>
    %52 = arith.mulf %51, %49 : vector<2x128xf32>
    %53 = arith.addf %43, %52 : vector<2x128xf32>
    %c1_40 = arith.constant 1 : index
    %c5_41 = arith.constant 5 : index
    %54 = memref.load %arg2[%c1_40, %c5_41] : memref<2x6xf32, #tpu.memory_space<smem>>
    %55 = vector.broadcast %54 : f32 to vector<2x128xf32>
    %56 = arith.mulf %55, %49 : vector<2x128xf32>
    %57 = arith.addf %47, %56 : vector<2x128xf32>
    %c0_42 = arith.constant 0 : index
    %58 = memref.load %arg3[%c0_42] : memref<2xf32, #tpu.memory_space<smem>>
    %59 = vector.broadcast %58 : f32 to vector<2x128xf32>
    %60 = arith.addf %53, %59 : vector<2x128xf32>
    %cst = arith.constant 0.000000e+00 : f32
    %61 = vector.broadcast %cst : f32 to vector<2x128xf32>
    %62 = arith.maximumf %60, %61 : vector<2x128xf32>
    %c0_43 = arith.constant 0 : index
    %63 = memref.load %arg4[%c0_43] : memref<2xf32, #tpu.memory_space<smem>>
    %64 = vector.broadcast %63 : f32 to vector<2x128xf32>
    %65 = arith.mulf %64, %62 : vector<2x128xf32>
    %c1_44 = arith.constant 1 : index
    %66 = memref.load %arg3[%c1_44] : memref<2xf32, #tpu.memory_space<smem>>
    %67 = vector.broadcast %66 : f32 to vector<2x128xf32>
    %68 = arith.addf %57, %67 : vector<2x128xf32>
    %cst_45 = arith.constant 0.000000e+00 : f32
    %69 = vector.broadcast %cst_45 : f32 to vector<2x128xf32>
    %70 = arith.maximumf %68, %69 : vector<2x128xf32>
    %c1_46 = arith.constant 1 : index
    %71 = memref.load %arg4[%c1_46] : memref<2xf32, #tpu.memory_space<smem>>
    %72 = vector.broadcast %71 : f32 to vector<2x128xf32>
    %73 = arith.mulf %72, %70 : vector<2x128xf32>
    %74 = arith.addf %65, %73 : vector<2x128xf32>
    %c0_47 = arith.constant 0 : index
    %75 = memref.load %arg5[%c0_47] : memref<1xf32, #tpu.memory_space<smem>>
    %76 = vector.broadcast %75 : f32 to vector<2x128xf32>
    %77 = arith.addf %74, %76 : vector<2x128xf32>
    %cst_48 = arith.constant 0.000000e+00 : f32
    %78 = vector.broadcast %cst_48 : f32 to vector<2x128xf32>
    %79 = arith.subf %78, %77 : vector<2x128xf32>
    %80 = math.exp %79 : vector<2x128xf32>
    %cst_49 = arith.constant 1.000000e+00 : f32
    %81 = vector.broadcast %cst_49 : f32 to vector<2x128xf32>
    %82 = arith.addf %81, %80 : vector<2x128xf32>
    %83 = tpu.reciprocal %82 : vector<2x128xf32> -> vector<2x128xf32>
    %c0_50 = arith.constant 0 : index
    %c0_51 = arith.constant 0 : index
    %c0_52 = arith.constant 0 : index
    %c0_53 = arith.constant 0 : index
    %84 = vector.load %arg6[%c0_50, %c0_51, %c0_52, %c0_53] : memref<1x6x2x128xf32, #tpu.memory_space<vmem>>, vector<1x1x2x128xf32>
    %85 = vector.shape_cast %84 : vector<1x1x2x128xf32> to vector<2x128xf32>
    %86 = arith.mulf %85, %83 : vector<2x128xf32>
    %c0_54 = arith.constant 0 : index
    %c0_55 = arith.constant 0 : index
    %c0_56 = arith.constant 0 : index
    %c0_57 = arith.constant 0 : index
    %87 = vector.load %arg7[%c0_54, %c0_55, %c0_56, %c0_57] : memref<1x6x2x128xf32, #tpu.memory_space<vmem>>, vector<1x1x2x128xf32>
    %88 = vector.shape_cast %87 : vector<1x1x2x128xf32> to vector<2x128xf32>
    %89 = vector.shape_cast %86 : vector<2x128xf32> to vector<1x1x2x128xf32>
    tpu.vector_store %arg7[%c0_54, %c0_55, %c0_56, %c0_57], %89 {strides = array<i32>} : memref<1x6x2x128xf32, #tpu.memory_space<vmem>>, vector<1x1x2x128xf32>,
    %c0_58 = arith.constant 0 : index
    %c1_59 = arith.constant 1 : index
    %c0_60 = arith.constant 0 : index
    %c0_61 = arith.constant 0 : index
    %90 = vector.load %arg6[%c0_58, %c1_59, %c0_60, %c0_61] : memref<1x6x2x128xf32, #tpu.memory_space<vmem>>, vector<1x1x2x128xf32>
    %91 = vector.shape_cast %90 : vector<1x1x2x128xf32> to vector<2x128xf32>
    %92 = arith.mulf %91, %83 : vector<2x128xf32>
    %c0_62 = arith.constant 0 : index
    %c1_63 = arith.constant 1 : index
    %c0_64 = arith.constant 0 : index
    %c0_65 = arith.constant 0 : index
    %93 = vector.load %arg7[%c0_62, %c1_63, %c0_64, %c0_65] : memref<1x6x2x128xf32, #tpu.memory_space<vmem>>, vector<1x1x2x128xf32>
    %94 = vector.shape_cast %93 : vector<1x1x2x128xf32> to vector<2x128xf32>
    %95 = vector.shape_cast %92 : vector<2x128xf32> to vector<1x1x2x128xf32>
    tpu.vector_store %arg7[%c0_62, %c1_63, %c0_64, %c0_65], %95 {strides = array<i32>} : memref<1x6x2x128xf32, #tpu.memory_space<vmem>>, vector<1x1x2x128xf32>,
    %c0_66 = arith.constant 0 : index
    %c2_67 = arith.constant 2 : index
    %c0_68 = arith.constant 0 : index
    %c0_69 = arith.constant 0 : index
    %96 = vector.load %arg6[%c0_66, %c2_67, %c0_68, %c0_69] : memref<1x6x2x128xf32, #tpu.memory_space<vmem>>, vector<1x1x2x128xf32>
    %97 = vector.shape_cast %96 : vector<1x1x2x128xf32> to vector<2x128xf32>
    %98 = arith.mulf %97, %83 : vector<2x128xf32>
    %c0_70 = arith.constant 0 : index
    %c2_71 = arith.constant 2 : index
    %c0_72 = arith.constant 0 : index
    %c0_73 = arith.constant 0 : index
    %99 = vector.load %arg7[%c0_70, %c2_71, %c0_72, %c0_73] : memref<1x6x2x128xf32, #tpu.memory_space<vmem>>, vector<1x1x2x128xf32>
    %100 = vector.shape_cast %99 : vector<1x1x2x128xf32> to vector<2x128xf32>
    %101 = vector.shape_cast %98 : vector<2x128xf32> to vector<1x1x2x128xf32>
    tpu.vector_store %arg7[%c0_70, %c2_71, %c0_72, %c0_73], %101 {strides = array<i32>} : memref<1x6x2x128xf32, #tpu.memory_space<vmem>>, vector<1x1x2x128xf32>,
    %c0_74 = arith.constant 0 : index
    %c3_75 = arith.constant 3 : index
    %c0_76 = arith.constant 0 : index
    %c0_77 = arith.constant 0 : index
    %102 = vector.load %arg6[%c0_74, %c3_75, %c0_76, %c0_77] : memref<1x6x2x128xf32, #tpu.memory_space<vmem>>, vector<1x1x2x128xf32>
    %103 = vector.shape_cast %102 : vector<1x1x2x128xf32> to vector<2x128xf32>
    %104 = arith.mulf %103, %83 : vector<2x128xf32>
    %c0_78 = arith.constant 0 : index
    %c3_79 = arith.constant 3 : index
    %c0_80 = arith.constant 0 : index
    %c0_81 = arith.constant 0 : index
    %105 = vector.load %arg7[%c0_78, %c3_79, %c0_80, %c0_81] : memref<1x6x2x128xf32, #tpu.memory_space<vmem>>, vector<1x1x2x128xf32>
    %106 = vector.shape_cast %105 : vector<1x1x2x128xf32> to vector<2x128xf32>
    %107 = vector.shape_cast %104 : vector<2x128xf32> to vector<1x1x2x128xf32>
    tpu.vector_store %arg7[%c0_78, %c3_79, %c0_80, %c0_81], %107 {strides = array<i32>} : memref<1x6x2x128xf32, #tpu.memory_space<vmem>>, vector<1x1x2x128xf32>,
    %c0_82 = arith.constant 0 : index
    %c4_83 = arith.constant 4 : index
    %c0_84 = arith.constant 0 : index
    %c0_85 = arith.constant 0 : index
    %108 = vector.load %arg6[%c0_82, %c4_83, %c0_84, %c0_85] : memref<1x6x2x128xf32, #tpu.memory_space<vmem>>, vector<1x1x2x128xf32>
    %109 = vector.shape_cast %108 : vector<1x1x2x128xf32> to vector<2x128xf32>
    %110 = arith.mulf %109, %83 : vector<2x128xf32>
    %c0_86 = arith.constant 0 : index
    %c4_87 = arith.constant 4 : index
    %c0_88 = arith.constant 0 : index
    %c0_89 = arith.constant 0 : index
    %111 = vector.load %arg7[%c0_86, %c4_87, %c0_88, %c0_89] : memref<1x6x2x128xf32, #tpu.memory_space<vmem>>, vector<1x1x2x128xf32>
    %112 = vector.shape_cast %111 : vector<1x1x2x128xf32> to vector<2x128xf32>
    %113 = vector.shape_cast %110 : vector<2x128xf32> to vector<1x1x2x128xf32>
    tpu.vector_store %arg7[%c0_86, %c4_87, %c0_88, %c0_89], %113 {strides = array<i32>} : memref<1x6x2x128xf32, #tpu.memory_space<vmem>>, vector<1x1x2x128xf32>,
    %c0_90 = arith.constant 0 : index
    %c5_91 = arith.constant 5 : index
    %c0_92 = arith.constant 0 : index
    %c0_93 = arith.constant 0 : index
    %114 = vector.load %arg6[%c0_90, %c5_91, %c0_92, %c0_93] : memref<1x6x2x128xf32, #tpu.memory_space<vmem>>, vector<1x1x2x128xf32>
    %115 = vector.shape_cast %114 : vector<1x1x2x128xf32> to vector<2x128xf32>
    %116 = arith.mulf %115, %83 : vector<2x128xf32>
    %c0_94 = arith.constant 0 : index
    %c5_95 = arith.constant 5 : index
    %c0_96 = arith.constant 0 : index
    %c0_97 = arith.constant 0 : index
    %117 = vector.load %arg7[%c0_94, %c5_95, %c0_96, %c0_97] : memref<1x6x2x128xf32, #tpu.memory_space<vmem>>, vector<1x1x2x128xf32>
    %118 = vector.shape_cast %117 : vector<1x1x2x128xf32> to vector<2x128xf32>
    %119 = vector.shape_cast %116 : vector<2x128xf32> to vector<1x1x2x128xf32>
    tpu.vector_store %arg7[%c0_94, %c5_95, %c0_96, %c0_97], %119 {strides = array<i32>} : memref<1x6x2x128xf32, #tpu.memory_space<vmem>>, vector<1x1x2x128xf32>,
    return
  }
  func.func @transform_0(%arg0: i32, %arg1: i32) -> (i32, i32) {
    %c0_i32 = arith.constant 0 : i32
    %c0_i32_0 = arith.constant 0 : i32
    %c0_i32_1 = arith.constant 0 : i32
    return %c0_i32, %c0_i32_0 : i32, i32
  }
  func.func @transform_1(%arg0: i32, %arg1: i32) -> i32 {
    %c0_i32 = arith.constant 0 : i32
    %c0_i32_0 = arith.constant 0 : i32
    return %c0_i32 : i32
  }
  func.func @transform_2(%arg0: i32, %arg1: i32) -> i32 {
    %c0_i32 = arith.constant 0 : i32
    %c0_i32_0 = arith.constant 0 : i32
    return %c0_i32 : i32
  }
  func.func @transform_3(%arg0: i32, %arg1: i32) -> i32 {
    %c0_i32 = arith.constant 0 : i32
    %c0_i32_0 = arith.constant 0 : i32
    return %c0_i32 : i32
  }
  func.func @transform_4(%arg0: i32, %arg1: i32) -> (i32, i32, i32, i32) {
    %c0_i32 = arith.constant 0 : i32
    %c0_i32_0 = arith.constant 0 : i32
    %c0_i32_1 = arith.constant 0 : i32
    return %arg0, %c0_i32, %arg1, %c0_i32_0 : i32, i32, i32, i32
  }
  func.func @transform_5(%arg0: i32, %arg1: i32) -> (i32, i32, i32, i32) {
    %c0_i32 = arith.constant 0 : i32
    %c0_i32_0 = arith.constant 0 : i32
    %c0_i32_1 = arith.constant 0 : i32
    return %arg0, %c0_i32, %arg1, %c0_i32_0 : i32, i32, i32, i32
  }
}

</mosaic_0001>

<bundles_post_ra>
// kernel: pa_layer.1
= control target key start
LH: loop header
LB: loop body
LE: loop exit
PB: predicated region body
PF: predicated region fallthrough
CT: control target
= control target key end

     0   :  { %s850_s0 = inlined_call_operand.vmem [shape: f32[2,6], index: 0, kind: input, shape index: {}]   ;;  %s851_s1 = inlined_call_operand.vmem [shape: f32[2], index: 1, kind: input, shape index: {}]   ;;  %s852_s2 = inlined_call_operand.vmem [shape: f32[2], index: 2, kind: input, shape index: {}]   ;;  %s853_s3 = inlined_call_operand.<no memory space> [shape: f32[1], index: 3, kind: input, shape index: {}]   ;;  %s854_s4 = inlined_call_operand.vmem [shape: f32[2,6,2,128], index: 4, kind: input, shape index: {}]   ;;  %s855_s5 = inlined_call_operand.vmem [shape: f32[2,6,2,128], index: 5, kind: output, shape index: {}]  }
   0x1   :  { %10 = sst [smem:[#allocation2]] %s853_s3 }
   0x2   :  { %11 = vsyncpa [#allocation4], 0 }
   0x3   :  { %12 = vsyncpa [#allocation6], 0  ;;  %s729_s20 = smov 0   ;;  %s731_s21 = smov 0  }
   0x4   :  { %s733_s22 = smov 0  }
   0x5 LB: > { %s199_s24 = sshll.u32 %s851_s1, 4  ;;  %s513_s25 = sadd.s32 4294967295, %s691_s22   ;;  %s691_s22 = sphi %s733_s22, %s18_s22   ;;  %s687_s21 = sphi %s731_s21, %s866_s21   ;;  %s683_s20 = sphi %s729_s20, %s865_s20   ;;  %s200_s24 = int_to_ptr.vmem [resolvable:$true] %s199_s24 }
   0x6   : > { %p515_p0 = scmp.ge.s32.totalorder %s691_s22, 1  ;;  %p175_p1 = scmp.lt.s32.totalorder %s691_s22, 3 }
   0x7   : > { %p750_p2 = scmp.eq.s32.totalorder %s513_s25, 0  ;;  %s30_s28 = sadd.s32 1, %s687_s21 }
   0x8   : > { %p754_p3 = pnand %p515_p0, %p175_p1  ;;  %s188_s6 = sshll.u32 %s850_s0, 4  ;;  %s189_s6 = int_to_ptr.vmem [resolvable:$true] %s188_s6 }
   0x9   : > { %s859_s26 = scalar_select %p750_p2, 1, 0 }
   0xa   : > { %s860_s27 = scalar_select %p754_p3, 1, 0 }
   0xb   : > { %p569_p4 = pneg %p754_p3  ;;  %p770_p6 = scmp.ge.s32.totalorder %s30_s28, 2 }
   0xc   : > { %s210_s11 = sshll.u32 %s852_s2, 4  ;;  %s616_s12 = scalar_lea.vmem %s200_s24, 16  ;;  %s211_s11 = int_to_ptr.vmem [resolvable:$true] %s210_s11 }
   0xd   : > { %p766_p5 = pnand %p750_p2, %p569_p4  ;;  %p617_p7 = scmp.ne.s32.totalorder %s200_s24, %s616_s12 }
   0xe   : > { %p624_p11 = scmp.lt.s32.totalorder %s200_s24, %s200_s24  ;;  %p625_p12 = scmp.lt.s32.totalorder %s616_s12, %s616_s12 }
   0xf   : > { %p618_p8 = pneg %p766_p5 }
  0x10   : > { %p626_p13 = por %p625_p12, %p624_p11 }
  0x11   : > { %p619_p9 = pnand %p618_p8, %p617_p7 }
  0x13   : > { %p620_p10 = pneg %p619_p9 }
  0x15   : > { %p627_p0 = pnand %p626_p13, %p620_p10 }
  0x17   : > { %630 = shalt.err (!%p627_p0)
}
  0x18   : > { %s693_s13 = smov [#allocation5]   ;;  %s868_s28 = smov (%p770_p6, %s30_s28), 0 }
  0x19   : > { %575 = dma.vmem_to_smem (!%p766_p5), %s200_s24, 16, %s693_s13, [#allocation6]  }
  0x1a   : > { %s631_s14 = scalar_lea.vmem %s189_s6, 32  ;;  %p639_p9 = scmp.lt.s32.totalorder %s189_s6, %s189_s6 }
  0x1b   : > { %p632_p1 = scmp.ne.s32.totalorder %s189_s6, %s631_s14  ;;  %p640_p2 = scmp.lt.s32.totalorder %s631_s14, %s631_s14 }
  0x1d   : > { %p634_p4 = pnand %p632_p1, %p618_p8  ;;  %p641_p11 = por %p640_p2, %p639_p9 }
  0x1f   : > { %p635_p7 = pneg %p634_p4 }
  0x21   : > { %p642_p10 = pnand %p641_p11, %p635_p7 }
  0x23   : > { %645 = shalt.err (!%p642_p10)
}
  0x24   : > { %s694_s15 = smov [#allocation3]   ;;  %s646_s16 = scalar_lea.vmem %s211_s11, 16 }
  0x25   : > { %572 = dma.vmem_to_smem (!%p766_p5), %s189_s6, 32, %s694_s15, [#allocation4]  }
  0x26   : > { %p647_p6 = scmp.ne.s32.totalorder %s211_s11, %s646_s16  ;;  %p654_p0 = scmp.lt.s32.totalorder %s211_s11, %s211_s11 }
  0x27   : > { %p655_p1 = scmp.lt.s32.totalorder %s646_s16, %s646_s16 }
  0x28   : > { %p649_p12 = pnand %p647_p6, %p618_p8 }
  0x29   : > { %p656_p4 = por %p655_p1, %p654_p0 }
  0x2a   : > { %p650_p13 = pneg %p649_p12 }
  0x2c   : > { %p657_p3 = pnand %p656_p4, %p650_p13 }
  0x2e   : > { %660 = shalt.err (!%p657_p3)
}
  0x2f   : > { %s695_s17 = smov [#allocation7]   ;;  %p863_p2 = scmp.ne.s32.totalorder %s860_s27, 0 }
  0x30   : > { %578 = dma.vmem_to_smem (!%p766_p5), %s211_s11, 16, %s695_s17, [#allocation6]  }
  0x31   : > { %237 = sbr.rel (%p863_p2) target bundleno = 131 (0x83), region = 40  ;;  %p864_p7 = scmp.ne.s32.totalorder (!%p863_p2), %s859_s26, 0 }
  0x36   : > { %674 = dma.done.wait (%p864_p7), [#allocation4], 32  }
  0x37   : > { %676 = vsyncadd (%p864_p7), [#allocation4], 4294967264 }
  0x38   : > { %678 = dma.done.wait (%p864_p7), [#allocation6], 32  }
  0x39   : > { %680 = vsyncadd (%p864_p7), [#allocation6], 4294967264 }
  0x3a   : > { %251 = sfence }
  0x3b   : > { %p280_p3 = scmp.lt.s32.totalorder %s683_s20, 1  ;;  %s297_s18 = sld [smem:[#allocation3]] }
  0x3c   : > { %s526_s19 = sld [smem:[#allocation3 + $0x80]] }
  0x3d   : > { %s870_s20 = smov (!%p280_p3, %s683_s20), 1  ;;  %s528_s3 = sld [smem:[#allocation3 + $0x1]] }
  0x3e   : > { %s556_s23 = smul.u32 12, %s870_s20  ;;  %s529_s24 = sld [smem:[#allocation3 + $0x81]] }
  0x3f   : > { %s531_s25 = sld [smem:[#allocation3 + $0x2]] }
  0x40   : > { %s818_s26 = scalar_lea.vmem %s854_s4, %s556_s23  ;;  %s532_s30 = sld [smem:[#allocation3 + $0x82]] }
  0x41   : > { %v298_v0 = vstv %s297_s18  ;;  %v821_v1 = vld [vmem:[%s818_s26] sm:$0x3]  ;;  %v527_v3 = vld [vmem:[%s818_s26 + $0x2] sm:$0x3]  ;;  %v530_v7 = vld [vmem:[%s818_s26 + $0x4] sm:$0x3] }
  0x42   : > { %v301_v2 = vstv %s526_s19  ;;  %v299_v4 = vmul.f32 %v298_v0, %v821_v1  ;;  %s534_s6 = sld [smem:[#allocation3 + $0x3]]  ;;  %v533_v15 = vld [vmem:[%s818_s26 + $0x6] sm:$0x3]  ;;  %v536_v20 = vld [vmem:[%s818_s26 + $0x8] sm:$0x3]  ;;  %s295_s19 = scalar_lea.vmem %s855_s5, %s556_s23 }
  0x43   : > { %v302_v5 = vmul.f32 %v301_v2, %v821_v1  ;;  %v306_v6 = vstv %s528_s3  ;;  %s535_s7 = sld [smem:[#allocation3 + $0x83]]  ;;  %v539_v26 = vld [vmem:[%s818_s26 + $0xa] sm:$0x3]  ;;  %v544_v57 = vld [vmem:[%s818_s26 + $0x2] sm:$0x3] }
  0x44   : > { %v307_v8 = vmul.f32 %v527_v3, %v306_v6  ;;  %v310_v9 = vstv %s529_s24  ;;  %s537_s8 = sld [smem:[#allocation3 + $0x4]]  ;;  %v546_v58 = vld [vmem:[%s818_s26 + $0x4] sm:$0x3]  ;;  %v548_v59 = vld [vmem:[%s818_s26 + $0x6] sm:$0x3] }
  0x45   : > { %v311_v10 = vmul.f32 %v527_v3, %v310_v9  ;;  %v316_v11 = vstv %s531_s25  ;;  %s538_s9 = sld [smem:[#allocation3 + $0x84]]  ;;  %v550_v60 = vld [vmem:[%s818_s26 + $0x8] sm:$0x3]  ;;  %v552_v61 = vld [vmem:[%s818_s26 + $0xa] sm:$0x3] }
  0x46   : > { %v308_v12 = vadd.f32 %v307_v8, %v299_v4  ;;  %v317_v13 = vmul.f32 %v530_v7, %v316_v11  ;;  %s540_s10 = sld [smem:[#allocation3 + $0x5]]  ;;  %v320_v17 = vstv %s532_s30 }
  0x47   : > { %v312_v14 = vadd.f32 %v311_v10, %v302_v5  ;;  %s541_s11 = sld [smem:[#allocation3 + $0x85]]  ;;  %v321_v18 = vmul.f32 %v530_v7, %v320_v17 }
  0x48   : > { %v318_v16 = vadd.f32 %v317_v13, %v308_v12  ;;  %v326_v19 = vstv %s534_s6  ;;  %s353_s12 = sld [smem:[#allocation5]] }
  0x49   : > { %v327_v21 = vmul.f32 %v533_v15, %v326_v19  ;;  %v330_v22 = vstv %s535_s7  ;;  %s357_s13 = sld [smem:[#allocation7]]  ;;  %v322_v23 = vadd.f32 %v321_v18, %v312_v14 }
  0x4a   : > { %v331_v24 = vmul.f32 %v533_v15, %v330_v22  ;;  %v336_v25 = vstv %s537_s8  ;;  %s542_s14 = sld [smem:[#allocation5 + $0x1]] }
  0x4b   : > { %v328_v27 = vadd.f32 %v327_v21, %v318_v16  ;;  %v337_v28 = vmul.f32 %v536_v20, %v336_v25  ;;  %v340_v29 = vstv %s538_s9  ;;  %s543_s15 = sld [smem:[#allocation7 + $0x1]] }
  0x4c   : > { %v332_v30 = vadd.f32 %v331_v24, %v322_v23  ;;  %v341_v31 = vmul.f32 %v536_v20, %v340_v29  ;;  %v346_v32 = vstv %s540_s10  ;;  %s368_s16 = sld [smem:[#allocation2]] }
  0x4d   : > { %v338_v33 = vadd.f32 %v337_v28, %v328_v27  ;;  %v347_v34 = vmul.f32 %v539_v26, %v346_v32  ;;  %v350_v35 = vstv %s541_s11 }
  0x4e   : > { %v342_v36 = vadd.f32 %v341_v31, %v332_v30  ;;  %v351_v37 = vmul.f32 %v539_v26, %v350_v35  ;;  %v354_v38 = vstv %s353_s12 }
  0x4f   : > { %v348_v39 = vadd.f32 %v347_v34, %v338_v33  ;;  %v358_v43 = vstv %s357_s13 }
  0x50   : > { %v352_v40 = vadd.f32 %v351_v37, %v342_v36  ;;  %v361_v41 = vstv %s542_s14 }
  0x51   : > { %v355_v42 = vadd.f32 %v354_v38, %v348_v39  ;;  %v365_v46 = vstv %s543_s15 }
  0x52   : > { %v362_v44 = vadd.f32 %v361_v41, %v352_v40  ;;  %v369_v50 = vstv %s368_s16 }
  0x53   : > { %v356_v45 = vmax.f32 %v355_v42, 0.0 }
  0x54   : > { %v363_v47 = vmax.f32 %v362_v44, 0.0 }
  0x55   : > { %v359_v48 = vmul.f32 %v358_v43, %v356_v45 }
  0x56   : > { %v366_v49 = vmul.f32 %v365_v46, %v363_v47 }
  0x58   : > { %v367_v51 = vadd.f32 %v366_v49, %v359_v48 }
  0x5a   : > { %v370_v52 = vadd.f32 %v369_v50, %v367_v51 }
  0x5c   : > { %v371_v53 = vsub.f32 0.0, %v370_v52 }
  0x5e   : > { %v372_v54 = vmul.f32 1.442695, %v371_v53 }
  0x60   : > { %612 = vpow2.f32 %v372_v54 }
  0x6d   : > { %v613_v55 = vpop.eup %612 }
  0x6e   : > { %v374_v56 = vadd.f32 1.0, %v613_v55 }
  0x70   : > { %614 = vrcp.f32 %v374_v56 }
  0x7d   : > { %v615_v62 = vpop.eup %614 }
  0x7e   : > { %v376_v63 = vmul.f32 %v615_v62, %v821_v1  ;;  %v379_v0 = vmul.f32 %v615_v62, %v544_v57  ;;  %v383_v2 = vmul.f32 %v615_v62, %v546_v58  ;;  %v387_v3 = vmul.f32 %v615_v62, %v548_v59 }
  0x7f   : > { %v391_v4 = vmul.f32 %v615_v62, %v550_v60  ;;  %v395_v5 = vmul.f32 %v615_v62, %v552_v61 }
  0x80   : > { %377 = vst [vmem:[%s295_s19] sm:$0x3] %v376_v63  ;;  %545 = vst [vmem:[%s295_s19 + $0x2] sm:$0x3] %v379_v0 }
  0x81   : > { %547 = vst [vmem:[%s295_s19 + $0x4] sm:$0x3] %v383_v2  ;;  %549 = vst [vmem:[%s295_s19 + $0x6] sm:$0x3] %v387_v3 }
  0x82   : > { %551 = vst [vmem:[%s295_s19 + $0x8] sm:$0x3] %v391_v4  ;;  %553 = vst [vmem:[%s295_s19 + $0xa] sm:$0x3] %v395_v5 }
  0x83 PF: > { %s18_s22 = sadd.s32 1, %s691_s22   ;;  %s865_s20 = smov %s687_s21 }
  0x84   : > { %p15_p5 = scmp.ge.s32.totalorder %s18_s22, 4   ;;  %s866_s21 = smov %s868_s28 }
  0x86   :  { %17 = sbr.rel (!%p15_p5) target bundleno = 5 (0x5), region = 93 }
  0x8b   :  { %425 = vsyncpa [#allocation4], 1 }
  0x8c   :  { %427 = vsyncpa [#allocation4 + $0x1], 1 }
  0x8d   :  { %428 = vsyncpa [#allocation6], 1 }

</bundles_post_ra>
